<compile_context>
chip_gen: v6e
topology: v6e:2x2x1
jax: 0.10.0
libtpu: 0.0.40
codegen_flags: <defaults>
</compile_context>

<pallas_src>
import functools

import jax
import jax.numpy as jnp
from jax.experimental import pallas as pl
from jax.experimental.pallas import tpu as pltpu


def _round_up(x, m):
    return (x + m - 1) // m * m


def _scatter_add_kernel(pmin_ref, pmax_ref, idx_ref, inter_ref, out_ref, acc_ref):
    # pmin_ref/pmax_ref: (n_pair_tiles,) int32 in SMEM (scalar-prefetch)
    # idx_ref:   (1, tp)  int32  -- target atom index for each pair in this tile
    # inter_ref: (tp, tc) float  -- pairwise interaction tile
    # out_ref:   (ta, tc) float  -- per-atom output tile
    # acc_ref:   (ta, tc) f32    -- accumulator scratch (lives across the p axis)
    a = pl.program_id(0)          # atom-tile index (parallel)
    p = pl.program_id(2)          # pair-tile index (reduction, innermost)
    ta = out_ref.shape[0]
    tp = inter_ref.shape[0]

    @pl.when(p == 0)
    def _():
        acc_ref[...] = jnp.zeros_like(acc_ref)

    lo = a * ta
    hi = lo + (ta - 1)
    # Skip whole tiles this pair block cannot touch (indices clustered/sorted).
    hit = jnp.logical_and(pmin_ref[p] <= hi, pmax_ref[p] >= lo)

    @pl.when(hit)
    def _():
        rows = lo + jax.lax.broadcasted_iota(jnp.int32, (ta, tp), 0)   # (ta, tp)
        # One-hot scatter matrix in inter's dtype (0/1 exact in bf16; keeps the
        # MXU at native rate for bf16 inputs, exact f32 x f32 for f32 inputs).
        onehot = (rows == idx_ref[...]).astype(inter_ref.dtype)        # (ta, tp)
        acc_ref[...] += jnp.dot(onehot, inter_ref[...],
                                preferred_element_type=jnp.float32)    # (ta, tc)

    @pl.when(p == pl.num_programs(2) - 1)
    def _():
        out_ref[...] = acc_ref[...].astype(out_ref.dtype)


@functools.partial(jax.jit,
                   static_argnames=("n_atoms", "tile_c", "tile_p",
                                    "vmem_budget_bytes"))
def ip_layer(idx_i, inter, *, n_atoms, tile_c=256, tile_p=512,
             vmem_budget_bytes=20 * 1024 * 1024):
    """Pallas implementation of IPLayer.forward (scatter_add along dim 0)."""
    P, C = inter.shape
    dtype = inter.dtype
    s = jnp.dtype(dtype).itemsize

    # Channel / pair tiles: lane-dense (multiples of 128), clamped to problem.
    tc = min(tile_c, _round_up(C, 128))
    tp = min(tile_p, _round_up(max(P, 1), 128))

    # Pick the largest atom tile that fits the VMEM budget; when the whole atom
    # dimension fits, `inter` is read from HBM exactly once.
    A8 = _round_up(max(n_atoms, 1), 8)
    per_row = tc * 4 + 2 * tc * s + 2 * tp * 4     # acc + out dbl-buf + onehot/iota temps
    fixed = 2 * tp * tc * s + 2 * tp * 4           # inter dbl-buf + idx tile
    avail = max(vmem_budget_bytes - fixed, 0)
    ta = max(8, min(A8, (avail // per_row) // 8 * 8))

    A_pad = _round_up(A8, ta)
    C_pad = _round_up(C, tc)
    P_pad = _round_up(max(P, 1), tp)

    # Pad: extra pairs get idx=-1 (never matches) and zero interactions; extra
    # channels/atoms are zero and sliced off afterwards.
    inter_p = jnp.pad(inter, ((0, P_pad - P), (0, C_pad - C)))
    idx_p = jnp.pad(idx_i.astype(jnp.int32), (0, P_pad - P), constant_values=-1)
    idx2d = idx_p.reshape(1, P_pad)

    # Per pair-tile index range, scalar-prefetched into SMEM for tile skipping.
    idx_tiles = idx_p.reshape(P_pad // tp, tp)
    pmin = idx_tiles.min(axis=1)
    pmax = idx_tiles.max(axis=1)

    grid = (A_pad // ta, C_pad // tc, P_pad // tp)

    cost = pl.CostEstimate(
        flops=2 * A_pad * P_pad * C_pad,
        transcendentals=0,
        bytes_accessed=P_pad * C_pad * s            # inter
        + A_pad * C_pad * s                         # out
        + P_pad * 4                                 # idx
        + 2 * (P_pad // tp) * 4,                    # pmin/pmax
    )

    grid_spec = pltpu.PrefetchScalarGridSpec(
        num_scalar_prefetch=2,
        grid=grid,
        in_specs=[
            # indices: only the current pair tile
            pl.BlockSpec((1, tp), lambda a, c, p, pmin, pmax: (0, p)),
            # inter: (pair tile, channel tile)
            pl.BlockSpec((tp, tc), lambda a, c, p, pmin, pmax: (p, c)),
        ],
        # output block constant across the reduction (p) axis -> accumulator
        out_specs=pl.BlockSpec((ta, tc), lambda a, c, p, pmin, pmax: (a, c)),
        scratch_shapes=[pltpu.VMEM((ta, tc), jnp.float32)],
    )

    out_padded = pl.pallas_call(
        _scatter_add_kernel,
        out_shape=jax.ShapeDtypeStruct((A_pad, C_pad), dtype),
        grid_spec=grid_spec,
        compiler_params=pltpu.CompilerParams(
            dimension_semantics=("parallel", "parallel", "arbitrary"),
            vmem_limit_bytes=32 * 1024 * 1024,
        ),
        cost_estimate=cost,
    )(pmin, pmax, idx2d, inter_p)

    return out_padded[:n_atoms, :C]


if __name__ == "__main__":
    key = jax.random.PRNGKey(0)
    k1, k2, k3, k4 = jax.random.split(key, 4)

    # Test 1: small shapes consistent with the module (single atom tile).
    n_atoms, n_pairs, channels = 8, 16, 32
    idx_i = jax.random.randint(k1, (n_pairs,), 0, n_atoms, dtype=jnp.int32)
    inter = jax.random.normal(k2, (n_pairs, channels), dtype=jnp.float32)

    out = ip_layer(idx_i, inter, n_atoms=n_atoms)
    out = jax.block_until_ready(out)

    ref = jnp.zeros((n_atoms, channels), jnp.float32).at[idx_i].add(inter)
    assert out.shape == (n_atoms, channels)
    assert jnp.allclose(out, ref, atol=1e-5), "scatter_add mismatch (test 1)"

    # Test 2: force multiple atom tiles (tiny VMEM budget -> ta=8) to exercise
    # the accumulator reduction + per-tile skip path.
    n_atoms2, n_pairs2, channels2 = 40, 96, 32
    idx_i2 = jax.random.randint(k3, (n_pairs2,), 0, n_atoms2, dtype=jnp.int32)
    inter2 = jax.random.normal(k4, (n_pairs2, channels2), dtype=jnp.float32)

    out2 = ip_layer(idx_i2, inter2, n_atoms=n_atoms2, vmem_budget_bytes=1)
    out2 = jax.block_until_ready(out2)

    ref2 = jnp.zeros((n_atoms2, channels2), jnp.float32).at[idx_i2].add(inter2)
    assert out2.shape == (n_atoms2, channels2)
    assert jnp.allclose(out2, ref2, atol=1e-5), "scatter_add mismatch (test 2)"

    print("KERNEL_OK")
</pallas_src>

<mosaic_0001>
module attributes {stable_mosaic.version = 11 : i64} {
  func.func @_scatter_add_kernel(%arg0: i32, %arg1: i32, %arg2: i32, %arg3: memref<1xi32, #tpu.memory_space<smem>>, %arg4: memref<1xi32, #tpu.memory_space<smem>>, %arg5: memref<1x128xi32, #tpu.memory_space<vmem>>, %arg6: memref<128x128xf32, #tpu.memory_space<vmem>>, %arg7: memref<8x128xf32, #tpu.memory_space<vmem>>, %arg8: memref<8x128xf32, #tpu.memory_space<vmem>>) attributes {dimension_semantics = [#tpu.dimension_semantics<parallel>, #tpu.dimension_semantics<parallel>, #tpu.dimension_semantics<arbitrary>], iteration_bounds = array<i64: 1, 1, 1>, scalar_prefetch = 2 : i64, scratch_operands = 1 : i64, tpu.core_type = #tpu.core_type<tc>, window_params = [{transform_indices = @transform_0, window_bounds = array<i64: 1, 128>}, {transform_indices = @transform_1, window_bounds = array<i64: 128, 128>}, {transform_indices = @transform_2, window_bounds = array<i64: 8, 128>}]} {
    %c0_i32 = arith.constant 0 : i32
    %0 = arith.cmpi eq, %arg2, %c0_i32 : i32
    %1 = arith.extui %0 : i1 to i32
    %c0_i32_0 = arith.constant 0 : i32
    %2 = arith.cmpi ne, %1, %c0_i32_0 : i32
    scf.if %2 {
      %cst = arith.constant 0.000000e+00 : f32
      %17 = vector.broadcast %cst : f32 to vector<8x128xf32>
      %c0 = arith.constant 0 : index
      %c0_4 = arith.constant 0 : index
      %18 = vector.load %arg8[%c0, %c0_4] : memref<8x128xf32, #tpu.memory_space<vmem>>, vector<8x128xf32>
      tpu.vector_store %arg8[%c0, %c0_4], %17 {strides = array<i32>} : memref<8x128xf32, #tpu.memory_space<vmem>>, vector<8x128xf32>,
    } else {
    }
    %c8_i32 = arith.constant 8 : i32
    %3 = arith.muli %arg0, %c8_i32 : i32
    %c7_i32 = arith.constant 7 : i32
    %4 = arith.addi %3, %c7_i32 : i32
    %5 = arith.index_cast %arg2 : i32 to index
    %6 = memref.load %arg3[%5] : memref<1xi32, #tpu.memory_space<smem>>
    %7 = arith.cmpi sle, %6, %4 : i32
    %8 = arith.index_cast %arg2 : i32 to index
    %9 = memref.load %arg4[%8] : memref<1xi32, #tpu.memory_space<smem>>
    %10 = arith.cmpi sge, %9, %3 : i32
    %11 = arith.andi %7, %10 : i1
    %12 = arith.extui %11 : i1 to i32
    %c0_i32_1 = arith.constant 0 : i32
    %13 = arith.cmpi ne, %12, %c0_i32_1 : i32
    scf.if %13 {
      %17 = tpu.iota {dimensions = array<i32: 0>} : vector<8x128xi32>
      %18 = vector.broadcast %3 : i32 to vector<8x128xi32>
      %19 = arith.addi %18, %17 : vector<8x128xi32>
      %c0 = arith.constant 0 : index
      %c0_4 = arith.constant 0 : index
      %20 = vector.load %arg5[%c0, %c0_4] : memref<1x128xi32, #tpu.memory_space<vmem>>, vector<1x128xi32>
      %21 = vector.broadcast %20 : vector<1x128xi32> to vector<8x128xi32>
      %22 = arith.cmpi eq, %19, %21 : vector<8x128xi32>
      %23 = arith.extui %22 : vector<8x128xi1> to vector<8x128xi32>
      %24 = arith.sitofp %23 : vector<8x128xi32> to vector<8x128xf32>
      %c0_5 = arith.constant 0 : index
      %c0_6 = arith.constant 0 : index
      %25 = vector.load %arg8[%c0_5, %c0_6] : memref<8x128xf32, #tpu.memory_space<vmem>>, vector<8x128xf32>
      %c0_7 = arith.constant 0 : index
      %c0_8 = arith.constant 0 : index
      %26 = vector.load %arg6[%c0_7, %c0_8] : memref<128x128xf32, #tpu.memory_space<vmem>>, vector<128x128xf32>
      %cst = arith.constant dense<0.000000e+00> : vector<8x128xf32>
      %27 = tpu.matmul %24, %26, %cst {dimension_numbers = #tpu.dot_dimension_numbers<[1], [0], [0], [1], [0, 0, 1, 1], [], []>} : vector<8x128xf32>, vector<128x128xf32>, vector<8x128xf32> -> vector<8x128xf32>
      %28 = arith.addf %25, %27 : vector<8x128xf32>
      %c0_9 = arith.constant 0 : index
      %c0_10 = arith.constant 0 : index
      %29 = vector.load %arg8[%c0_9, %c0_10] : memref<8x128xf32, #tpu.memory_space<vmem>>, vector<8x128xf32>
      tpu.vector_store %arg8[%c0_9, %c0_10], %28 {strides = array<i32>} : memref<8x128xf32, #tpu.memory_space<vmem>>, vector<8x128xf32>,
    } else {
    }
    %c0_i32_2 = arith.constant 0 : i32
    %14 = arith.cmpi eq, %arg2, %c0_i32_2 : i32
    %15 = arith.extui %14 : i1 to i32
    %c0_i32_3 = arith.constant 0 : i32
    %16 = arith.cmpi ne, %15, %c0_i32_3 : i32
    scf.if %16 {
      %c0 = arith.constant 0 : index
      %c0_4 = arith.constant 0 : index
      %17 = vector.load %arg8[%c0, %c0_4] : memref<8x128xf32, #tpu.memory_space<vmem>>, vector<8x128xf32>
      %c0_5 = arith.constant 0 : index
      %c0_6 = arith.constant 0 : index
      %18 = vector.load %arg7[%c0_5, %c0_6] : memref<8x128xf32, #tpu.memory_space<vmem>>, vector<8x128xf32>
      tpu.vector_store %arg7[%c0_5, %c0_6], %17 {strides = array<i32>} : memref<8x128xf32, #tpu.memory_space<vmem>>, vector<8x128xf32>,
    } else {
    }
    return
  }
  func.func @transform_0(%arg0: i32, %arg1: i32, %arg2: i32, %arg3: memref<1xi32, #tpu.memory_space<smem>>, %arg4: memref<1xi32, #tpu.memory_space<smem>>) -> (i32, i32) {
    %c0_i32 = arith.constant 0 : i32
    %c0_i32_0 = arith.constant 0 : i32
    return %c0_i32, %arg2 : i32, i32
  }
  func.func @transform_1(%arg0: i32, %arg1: i32, %arg2: i32, %arg3: memref<1xi32, #tpu.memory_space<smem>>, %arg4: memref<1xi32, #tpu.memory_space<smem>>) -> (i32, i32) {
    %c0_i32 = arith.constant 0 : i32
    return %arg2, %arg1 : i32, i32
  }
  func.func @transform_2(%arg0: i32, %arg1: i32, %arg2: i32, %arg3: memref<1xi32, #tpu.memory_space<smem>>, %arg4: memref<1xi32, #tpu.memory_space<smem>>) -> (i32, i32) {
    %c0_i32 = arith.constant 0 : i32
    return %arg0, %arg1 : i32, i32
  }
}

</mosaic_0001>

<bundles_post_ra>
// kernel: ip_layer.1
= control target key start
LH: loop header
LB: loop body
LE: loop exit
PB: predicated region body
PF: predicated region fallthrough
CT: control target
= control target key end

     0   :  { %11 = vsyncpa [#allocation7], 0  ;;  %v233_v0 = vmov 0.0   ;;  %s323_s0 = inlined_call_operand.<no memory space> [shape: s32[1], index: 0, kind: input, shape index: {}]   ;;  %s324_s1 = inlined_call_operand.<no memory space> [shape: s32[1], index: 1, kind: input, shape index: {}]   ;;  %s325_s2 = inlined_call_operand.vmem [shape: s32[1,128], index: 2, kind: input, shape index: {}]   ;;  %s326_s3 = inlined_call_operand.vmem [shape: f32[128,128], index: 3, kind: input, shape index: {}]   ;;  %s327_s4 = inlined_call_operand.hbm [shape: f32[8,128], index: 4, kind: output, shape index: {}]  }
   0x1   :  { %p24_p0 = scmp.le.s32.totalorder %s323_s0, 7  ;;  %p26_p1 = scmp.ge.s32.totalorder %s324_s1, 0  ;;  %20 = vst [vmem:[#allocation2] sm:$0xff] %v233_v0 }
   0x3   :  { %p27_p2 = pnand %p26_p1, %p24_p0 }
   0x5   :  { %30 = sbr.rel (%p27_p2) target bundleno = 239 (0xef), region = 17 }
   0xa   :  { %v59_v1 = vld [vmem:[%s326_s3 + $0x78] sm:$0xff]  ;;  %v234_v2 = vmov 0.0   ;;  %v58_v3 = vld [vmem:[%s326_s3 + $0x70] sm:$0xff]  ;;  %vm235_vm0 = vmmov 0   ;;  %v57_v4 = vld [vmem:[%s326_s3 + $0x68] sm:$0xff]  ;;  %v31_v14 = vlaneseq  ;;  %v236_v21 = vmov 1.0  }
   0xb   :  { %171 = vmatprep.subr.mxu0 %v234_v2  ;;  %203 = vmatprep.mubr.msk.f32.mxu0 %vm235_vm0, %v234_v2  ;;  %v56_v5 = vld [vmem:[%s326_s3 + $0x60] sm:$0xff]  ;;  %v55_v6 = vld [vmem:[%s326_s3 + $0x58] sm:$0xff]  ;;  %v54_v7 = vld [vmem:[%s326_s3 + $0x50] sm:$0xff] }
   0xc   :  { %172 = vmatpush3.msra.mxu0 %v59_v1  ;;  %v53_v8 = vld [vmem:[%s326_s3 + $0x48] sm:$0xff]  ;;  %v52_v9 = vld [vmem:[%s326_s3 + $0x40] sm:$0xff]  ;;  %v51_v10 = vld [vmem:[%s326_s3 + $0x38] sm:$0xff]  ;;  %v32_v17 = vshrl.u32 %v31_v14, 7 }
   0xd   :  { %173 = vmatprep.subr.mxu0 %v234_v2  ;;  %v50_v11 = vld [vmem:[%s326_s3 + $0x30] sm:$0xff]  ;;  %v49_v12 = vld [vmem:[%s326_s3 + $0x28] sm:$0xff]  ;;  %v48_v13 = vld [vmem:[%s326_s3 + $0x20] sm:$0xff] }
   0xe   :  { %174 = vmatpush3.msra.mxu0 %v58_v3  ;;  %v47_v15 = vld [vmem:[%s326_s3 + $0x18] sm:$0xff]  ;;  %v46_v16 = vld [vmem:[%s326_s3 + $0x10] sm:$0xff]  ;;  %v45_v18 = vld [vmem:[%s326_s3 + $0x8] sm:$0xff] }
   0xf   :  { %175 = vmatprep.subr.mxu0 %v234_v2  ;;  %v151_v19 = vld [vmem:[%s325_s2] ss:$0 sm:$0xff]  ;;  %v43_v22 = vld [vmem:[#allocation2] sm:$0xff] }
  0x10   :  { %176 = vmatpush3.msra.mxu0 %v57_v4  ;;  %v44_v20 = vld [vmem:[%s326_s3] sm:$0xff]  ;;  %vm40_vm1 = vcmp.eq.s32.totalorder %v32_v17, %v151_v19 }
  0x11   :  { %177 = vmatprep.subr.mxu0 %v234_v2 }
  0x12   :  { %178 = vmatpush3.msra.mxu0 %v56_v5 }
  0x13   :  { %179 = vmatprep.subr.mxu0 %v234_v2 }
  0x14   :  { %180 = vmatpush3.msra.mxu0 %v55_v6 }
  0x15   :  { %181 = vmatprep.subr.mxu0 %v234_v2 }
  0x16   :  { %182 = vmatpush3.msra.mxu0 %v54_v7 }
  0x17   :  { %183 = vmatprep.subr.mxu0 %v234_v2 }
  0x18   :  { %184 = vmatpush3.msra.mxu0 %v53_v8 }
  0x19   :  { %185 = vmatprep.subr.mxu0 %v234_v2 }
  0x1a   :  { %186 = vmatpush3.msra.mxu0 %v52_v9 }
  0x1b   :  { %187 = vmatprep.subr.mxu0 %v234_v2 }
  0x1c   :  { %188 = vmatpush3.msra.mxu0 %v51_v10 }
  0x1d   :  { %189 = vmatprep.subr.mxu0 %v234_v2 }
  0x1e   :  { %190 = vmatpush3.msra.mxu0 %v50_v11 }
  0x1f   :  { %191 = vmatprep.subr.mxu0 %v234_v2 }
  0x20   :  { %192 = vmatpush3.msra.mxu0 %v49_v12 }
  0x21   :  { %193 = vmatprep.subr.mxu0 %v234_v2 }
  0x22   :  { %194 = vmatpush3.msra.mxu0 %v48_v13 }
  0x23   :  { %195 = vmatprep.subr.mxu0 %v234_v2 }
  0x24   :  { %196 = vmatpush3.msra.mxu0 %v47_v15 }
  0x25   :  { %197 = vmatprep.subr.mxu0 %v234_v2 }
  0x26   :  { %198 = vmatpush3.msra.mxu0 %v46_v16 }
  0x27   :  { %199 = vmatprep.subr.mxu0 %v234_v2 }
  0x28   :  { %200 = vmatpush3.msra.mxu0 %v45_v18 }
  0x29   :  { %201 = vmatprep.subr.mxu0 %v234_v2 }
  0x2a   :  { %202 = vmatpush3.msra.mxu0 %v44_v20 }
  0x2b   :  { %204 = vmatmul.mubr.msk.f32.vlgmr.msra.gmra.mxu0 %vm40_vm1, %v236_v21 }
  0xeb   :  { %v126_v23 = vpop.f32.mrf.mxu0 }
  0xec   :  { %v130_v24 = vadd.f32 %v126_v23, %v43_v22 }
  0xed   :  { %v205_v25 = vpop.f32.mrf.mxu0 }
  0xee   :  { %131 = vst [vmem:[#allocation2] sm:$0xff] %v130_v24 }
  0xef PF:  { %s237_s2 = smov [#allocation6]  }
  0xf0   :  { %s143_s23 = sshll.u32 %s237_s2, 4  ;;  %s144_s23 = int_to_ptr.vmem [resolvable:$true] %s143_s23 }
  0xf1   :  { %s211_s24 = scalar_lea.vmem %s144_s23, 128  ;;  %p216_p4 = scmp.lt.s32.totalorder %s144_s23, %s144_s23 }
  0xf2   :  { %p212_p3 = scmp.ne.s32.totalorder %s144_s23, %s211_s24  ;;  %p217_p5 = scmp.lt.s32.totalorder %s211_s24, %s211_s24 }
  0xf4   :  { %p218_p6 = por %p217_p5, %p216_p4 }
  0xf5   :  { %v135_v26 = vld [vmem:[#allocation2] sm:$0xff] }
  0xf6   :  { %136 = vst [vmem:[#allocation6] sm:$0xff] %v135_v26  ;;  %p219_p7 = pnand %p218_p6, %p212_p3 }
  0xf8   :  { %222 = shalt.err (!%p219_p7)
}
  0xf9   :  { %146 = dma.vmem_to_hbm [thread:$0]  %s144_s23, 128, %s327_s4, [#allocation7]  }
  0xfa   :  { %231 = dma.done.wait [#allocation7], 128  }
  0xfb   :  { %232 = vsyncadd [#allocation7], 4294967168 }
  0xfc   :  { %150 = vsyncpa [#allocation7], 1 }

</bundles_post_ra>
